<compile_context>
chip_gen: v5e
topology: v5e:2x2
jax: 0.10.0
libtpu: 0.0.40
codegen_flags: <defaults>
</compile_context>

<pallas_src>
import jax
import jax.numpy as jnp
from jax.experimental import pallas as pl
from jax.experimental.pallas import tpu as pltpu

IN_FEAT = 2      # module input features
H1_PAD = 128     # 64 hidden -> padded to full lane width (resident in VMEM)
H2_PAD = 128     # 36 hidden -> padded to full lane width (resident in VMEM)
OUT_PAD = 16     # 9 outputs -> padded to 16 lanes for the HBM writeback


def _round_up(n, m):
    return (n + m - 1) // m * m


def _pad2d(a, rows, cols):
    out = jnp.zeros((rows, cols), jnp.float32)
    return out.at[: a.shape[0], : a.shape[1]].set(a.astype(jnp.float32))


def tictactoe_kernel(x_ref, w1_ref, b1_ref, w2_ref, b2_ref, w3_ref, b3_ref, o_ref):
    # One (tb, 2) batch tile per grid step; weights/biases are resident (index_map (0,0)).
    x = x_ref[...]                                              # (tb, 2) f32
    w1 = w1_ref[...]                                            # (2, 128) f32

    # Layer 1 on the VPU: K=2 contraction as two broadcasted rank-1 updates.
    h1 = x[:, 0:1] * w1[0:1, :] + x[:, 1:2] * w1[1:2, :] + b1_ref[...]
    h1 = jnp.maximum(h1, 0.0)                                   # relu; padded lanes stay 0

    # Layers 2/3 on the MXU with f32 accumulation.
    h2 = jnp.dot(h1, w2_ref[...], preferred_element_type=jnp.float32) + b2_ref[...]
    h2 = jnp.maximum(h2, 0.0)                                   # relu

    logits = jnp.dot(h2, w3_ref[...], preferred_element_type=jnp.float32) + b3_ref[...]
    o_ref[...] = jax.nn.sigmoid(logits)                         # (tb, 16); lanes 9..15 = 0.5


def prepare_params(params):
    """Pad weights/biases to lane-friendly shapes ONCE (hoisted out of the call path)."""
    w1, b1, w2, b2, w3, b3 = params
    return (
        _pad2d(w1, IN_FEAT, H1_PAD),                 # (2, 128)
        _pad2d(b1.reshape(1, -1), 1, H1_PAD),        # (1, 128)
        _pad2d(w2, H1_PAD, H2_PAD),                  # (128, 128)
        _pad2d(b2.reshape(1, -1), 1, H2_PAD),        # (1, 128)
        _pad2d(w3, H2_PAD, OUT_PAD),                 # (128, 16)
        _pad2d(b3.reshape(1, -1), 1, OUT_PAD),       # (1, 16)
    )


def _choose_tile(batch, block_batch):
    """Row tile: multiple of 8, capped at block_batch, and small enough that the
    grid has >=2 steps whenever batch allows (v7x 2-TC megacore split)."""
    rb = _round_up(batch, 8)
    half = _round_up(pl.cdiv(rb, 2), 8)
    return max(8, min(block_batch, half))


def tictactoe_forward(x, prepared_params, *, block_batch=2048):
    """x: (batch, 2) any float dtype. Returns (batch, 9) f32 sigmoid probs."""
    w1p, b1p, w2p, b2p, w3p, b3p = prepared_params
    batch, in_feat = x.shape
    assert in_feat == IN_FEAT, "TicTacToe expects 2 input features"

    tb = _choose_tile(batch, block_batch)
    padded_batch = _round_up(batch, tb)

    x32 = x.astype(jnp.float32)
    if padded_batch != batch:
        xp = jnp.zeros((padded_batch, IN_FEAT), jnp.float32).at[:batch].set(x32)
    else:
        xp = x32

    grid = (padded_batch // tb,)
    x_spec = pl.BlockSpec((tb, IN_FEAT), lambda i: (i, 0))        # narrow input rows
    out_spec = pl.BlockSpec((tb, OUT_PAD), lambda i: (i, 0))      # 16-lane output rows
    w1_spec = pl.BlockSpec((IN_FEAT, H1_PAD), lambda i: (0, 0))   # resident
    b1_spec = pl.BlockSpec((1, H1_PAD), lambda i: (0, 0))
    w2_spec = pl.BlockSpec((H1_PAD, H2_PAD), lambda i: (0, 0))
    b2_spec = pl.BlockSpec((1, H2_PAD), lambda i: (0, 0))
    w3_spec = pl.BlockSpec((H2_PAD, OUT_PAD), lambda i: (0, 0))
    b3_spec = pl.BlockSpec((1, OUT_PAD), lambda i: (0, 0))

    out_padded = pl.pallas_call(
        tictactoe_kernel,
        out_shape=jax.ShapeDtypeStruct((padded_batch, OUT_PAD), jnp.float32),
        grid=grid,
        in_specs=[x_spec, w1_spec, b1_spec, w2_spec, b2_spec, w3_spec, b3_spec],
        out_specs=out_spec,
        compiler_params=pltpu.CompilerParams(
            dimension_semantics=("parallel",),
        ),
    )(xp, w1p, b1p, w2p, b2p, w3p, b3p)

    # Drop padded rows and the 7 padding lanes (sigmoid(0)=0.5).
    return out_padded[:batch, :9]


def init_params(key):
    # Deterministic synthetic init (PyTorch nn.Linear-style uniform bounds).
    # Weights stored pre-transposed as (in_features, out_features).
    k1, k2, k3, k4, k5, k6 = jax.random.split(key, 6)

    def lin(kw, kb, fan_in, fan_out):
        bound = 1.0 / jnp.sqrt(fan_in)
        w = jax.random.uniform(kw, (fan_in, fan_out), jnp.float32, -bound, bound)
        b = jax.random.uniform(kb, (1, fan_out), jnp.float32, -bound, bound)
        return w, b

    w1, b1 = lin(k1, k2, 2, 64)
    w2, b2 = lin(k3, k4, 64, 36)
    w3, b3 = lin(k5, k6, 36, 9)
    return (w1, b1, w2, b2, w3, b3)


def reference_forward(x, params):
    w1, b1, w2, b2, w3, b3 = params
    h1 = jnp.maximum(x.astype(jnp.float32) @ w1 + b1, 0.0)
    h2 = jnp.maximum(h1 @ w2 + b2, 0.0)
    return jax.nn.sigmoid(h2 @ w3 + b3)


if __name__ == "__main__":
    key = jax.random.PRNGKey(0)
    k_in, k_params = jax.random.split(key)

    batch = 8
    # TicTacToe module takes a 2-feature input vector per example.
    x = jax.random.uniform(k_in, (batch, 2), jnp.float32, -1.0, 1.0)
    params = init_params(k_params)
    prepared = prepare_params(params)   # pad once, outside the per-call path

    out = tictactoe_forward(x, prepared)
    out = jax.block_until_ready(out)

    ref = reference_forward(x, params)
    assert out.shape == (batch, 9)
    assert jnp.allclose(out, ref, atol=1e-5, rtol=1e-5)

    print("KERNEL_OK")
</pallas_src>

<mosaic_0001>
module attributes {stable_mosaic.version = 11 : i64} {
  func.func @tictactoe_kernel(%arg0: i32, %arg1: memref<8x2xf32, #tpu.memory_space<vmem>>, %arg2: memref<2x128xf32, #tpu.memory_space<vmem>>, %arg3: memref<1x128xf32, #tpu.memory_space<vmem>>, %arg4: memref<128x128xf32, #tpu.memory_space<vmem>>, %arg5: memref<1x128xf32, #tpu.memory_space<vmem>>, %arg6: memref<128x16xf32, #tpu.memory_space<vmem>>, %arg7: memref<1x16xf32, #tpu.memory_space<vmem>>, %arg8: memref<8x16xf32, #tpu.memory_space<vmem>>) attributes {dimension_semantics = [#tpu.dimension_semantics<parallel>], iteration_bounds = array<i64: 1>, scalar_prefetch = 0 : i64, scratch_operands = 0 : i64, tpu.core_type = #tpu.core_type<tc>, window_params = [{transform_indices = @transform_0, window_bounds = array<i64: 8, 2>}, {pipeline_mode = #tpu.pipeline_mode<synchronous>, transform_indices = @transform_1, window_bounds = array<i64: 2, 128>}, {pipeline_mode = #tpu.pipeline_mode<synchronous>, transform_indices = @transform_2, window_bounds = array<i64: 1, 128>}, {pipeline_mode = #tpu.pipeline_mode<synchronous>, transform_indices = @transform_3, window_bounds = array<i64: 128, 128>}, {pipeline_mode = #tpu.pipeline_mode<synchronous>, transform_indices = @transform_4, window_bounds = array<i64: 1, 128>}, {pipeline_mode = #tpu.pipeline_mode<synchronous>, transform_indices = @transform_5, window_bounds = array<i64: 128, 16>}, {pipeline_mode = #tpu.pipeline_mode<synchronous>, transform_indices = @transform_6, window_bounds = array<i64: 1, 16>}, {transform_indices = @transform_7, window_bounds = array<i64: 8, 16>}]} {
    %c0 = arith.constant 0 : index
    %c0_0 = arith.constant 0 : index
    %0 = vector.load %arg1[%c0, %c0_0] : memref<8x2xf32, #tpu.memory_space<vmem>>, vector<8x2xf32>
    %c0_1 = arith.constant 0 : index
    %c0_2 = arith.constant 0 : index
    %1 = vector.load %arg2[%c0_1, %c0_2] : memref<2x128xf32, #tpu.memory_space<vmem>>, vector<2x128xf32>
    %2 = vector.extract_strided_slice %0 {offsets = [0, 0], sizes = [8, 1], strides = [1, 1]} : vector<8x2xf32> to vector<8x1xf32>
    %3 = vector.extract_strided_slice %1 {offsets = [0, 0], sizes = [1, 128], strides = [1, 1]} : vector<2x128xf32> to vector<1x128xf32>
    %4 = vector.broadcast %2 : vector<8x1xf32> to vector<8x128xf32>
    %5 = vector.broadcast %3 : vector<1x128xf32> to vector<8x128xf32>
    %6 = arith.mulf %4, %5 : vector<8x128xf32>
    %7 = vector.extract_strided_slice %0 {offsets = [0, 1], sizes = [8, 1], strides = [1, 1]} : vector<8x2xf32> to vector<8x1xf32>
    %8 = vector.extract_strided_slice %1 {offsets = [1, 0], sizes = [1, 128], strides = [1, 1]} : vector<2x128xf32> to vector<1x128xf32>
    %9 = vector.broadcast %7 : vector<8x1xf32> to vector<8x128xf32>
    %10 = vector.broadcast %8 : vector<1x128xf32> to vector<8x128xf32>
    %11 = arith.mulf %9, %10 : vector<8x128xf32>
    %12 = arith.addf %6, %11 : vector<8x128xf32>
    %c0_3 = arith.constant 0 : index
    %c0_4 = arith.constant 0 : index
    %13 = vector.load %arg3[%c0_3, %c0_4] : memref<1x128xf32, #tpu.memory_space<vmem>>, vector<1x128xf32>
    %14 = vector.broadcast %13 : vector<1x128xf32> to vector<8x128xf32>
    %15 = arith.addf %12, %14 : vector<8x128xf32>
    %cst = arith.constant 0.000000e+00 : f32
    %16 = vector.broadcast %cst : f32 to vector<8x128xf32>
    %17 = arith.maximumf %15, %16 : vector<8x128xf32>
    %c0_5 = arith.constant 0 : index
    %c0_6 = arith.constant 0 : index
    %18 = vector.load %arg4[%c0_5, %c0_6] : memref<128x128xf32, #tpu.memory_space<vmem>>, vector<128x128xf32>
    %cst_7 = arith.constant dense<0.000000e+00> : vector<8x128xf32>
    %19 = tpu.matmul %17, %18, %cst_7 {dimension_numbers = #tpu.dot_dimension_numbers<[1], [0], [0], [1], [0, 0, 1, 1], [], []>} : vector<8x128xf32>, vector<128x128xf32>, vector<8x128xf32> -> vector<8x128xf32>
    %c0_8 = arith.constant 0 : index
    %c0_9 = arith.constant 0 : index
    %20 = vector.load %arg5[%c0_8, %c0_9] : memref<1x128xf32, #tpu.memory_space<vmem>>, vector<1x128xf32>
    %21 = vector.broadcast %20 : vector<1x128xf32> to vector<8x128xf32>
    %22 = arith.addf %19, %21 : vector<8x128xf32>
    %cst_10 = arith.constant 0.000000e+00 : f32
    %23 = vector.broadcast %cst_10 : f32 to vector<8x128xf32>
    %24 = arith.maximumf %22, %23 : vector<8x128xf32>
    %c0_11 = arith.constant 0 : index
    %c0_12 = arith.constant 0 : index
    %25 = vector.load %arg6[%c0_11, %c0_12] : memref<128x16xf32, #tpu.memory_space<vmem>>, vector<128x16xf32>
    %cst_13 = arith.constant dense<0.000000e+00> : vector<8x16xf32>
    %26 = tpu.matmul %24, %25, %cst_13 {dimension_numbers = #tpu.dot_dimension_numbers<[1], [0], [0], [1], [0, 0, 1, 1], [], []>} : vector<8x128xf32>, vector<128x16xf32>, vector<8x16xf32> -> vector<8x16xf32>
    %c0_14 = arith.constant 0 : index
    %c0_15 = arith.constant 0 : index
    %27 = vector.load %arg7[%c0_14, %c0_15] : memref<1x16xf32, #tpu.memory_space<vmem>>, vector<1x16xf32>
    %28 = vector.broadcast %27 : vector<1x16xf32> to vector<8x16xf32>
    %29 = arith.addf %26, %28 : vector<8x16xf32>
    %30 = arith.negf %29 : vector<8x16xf32>
    %31 = math.exp %30 : vector<8x16xf32>
    %cst_16 = arith.constant 1.000000e+00 : f32
    %32 = vector.broadcast %cst_16 : f32 to vector<8x16xf32>
    %33 = arith.addf %32, %31 : vector<8x16xf32>
    %34 = arith.divf %32, %33 : vector<8x16xf32>
    %c0_17 = arith.constant 0 : index
    %c0_18 = arith.constant 0 : index
    %35 = vector.load %arg8[%c0_17, %c0_18] : memref<8x16xf32, #tpu.memory_space<vmem>>, vector<8x16xf32>
    tpu.vector_store %arg8[%c0_17, %c0_18], %34 {strides = array<i32>} : memref<8x16xf32, #tpu.memory_space<vmem>>, vector<8x16xf32>,
    return
  }
  func.func @transform_0(%arg0: i32) -> (i32, i32) {
    %c0_i32 = arith.constant 0 : i32
    %c0_i32_0 = arith.constant 0 : i32
    return %arg0, %c0_i32 : i32, i32
  }
  func.func @transform_1(%arg0: i32) -> (i32, i32) {
    %c0_i32 = arith.constant 0 : i32
    %c0_i32_0 = arith.constant 0 : i32
    %c0_i32_1 = arith.constant 0 : i32
    return %c0_i32, %c0_i32_0 : i32, i32
  }
  func.func @transform_2(%arg0: i32) -> (i32, i32) {
    %c0_i32 = arith.constant 0 : i32
    %c0_i32_0 = arith.constant 0 : i32
    %c0_i32_1 = arith.constant 0 : i32
    return %c0_i32, %c0_i32_0 : i32, i32
  }
  func.func @transform_3(%arg0: i32) -> (i32, i32) {
    %c0_i32 = arith.constant 0 : i32
    %c0_i32_0 = arith.constant 0 : i32
    %c0_i32_1 = arith.constant 0 : i32
    return %c0_i32, %c0_i32_0 : i32, i32
  }
  func.func @transform_4(%arg0: i32) -> (i32, i32) {
    %c0_i32 = arith.constant 0 : i32
    %c0_i32_0 = arith.constant 0 : i32
    %c0_i32_1 = arith.constant 0 : i32
    return %c0_i32, %c0_i32_0 : i32, i32
  }
  func.func @transform_5(%arg0: i32) -> (i32, i32) {
    %c0_i32 = arith.constant 0 : i32
    %c0_i32_0 = arith.constant 0 : i32
    %c0_i32_1 = arith.constant 0 : i32
    return %c0_i32, %c0_i32_0 : i32, i32
  }
  func.func @transform_6(%arg0: i32) -> (i32, i32) {
    %c0_i32 = arith.constant 0 : i32
    %c0_i32_0 = arith.constant 0 : i32
    %c0_i32_1 = arith.constant 0 : i32
    return %c0_i32, %c0_i32_0 : i32, i32
  }
  func.func @transform_7(%arg0: i32) -> (i32, i32) {
    %c0_i32 = arith.constant 0 : i32
    %c0_i32_0 = arith.constant 0 : i32
    return %arg0, %c0_i32 : i32, i32
  }
}

</mosaic_0001>

<bundles_post_ra>
// kernel: tpu_custom_call.1
= control target key start
LH: loop header
LB: loop body
LE: loop exit
PB: predicated region body
PF: predicated region fallthrough
CT: control target
= control target key end

     0   :  { %v206_v3 = vmov 0   ;;  %s363_s0 = inlined_call_operand.vmem [shape: f32[8,2], index: 0, kind: input, shape index: {}]   ;;  %s364_s1 = inlined_call_operand.vmem [shape: f32[2,128], index: 1, kind: input, shape index: {}]   ;;  %s365_s2 = inlined_call_operand.vmem [shape: f32[1,128], index: 2, kind: input, shape index: {}]   ;;  %s366_s3 = inlined_call_operand.vmem [shape: f32[128,128], index: 3, kind: input, shape index: {}]   ;;  %s367_s4 = inlined_call_operand.vmem [shape: f32[1,128], index: 4, kind: input, shape index: {}]   ;;  %s368_s5 = inlined_call_operand.vmem [shape: f32[128,16], index: 5, kind: input, shape index: {}]   ;;  %s369_s6 = inlined_call_operand.vmem [shape: f32[1,16], index: 6, kind: input, shape index: {}]   ;;  %s370_s7 = inlined_call_operand.hbm [shape: f32[8,16], index: 7, kind: output, shape index: {}]  }
   0x1   :  { %v27_v0 = vld [vmem:[%s363_s0] sm:$0xff]  ;;  %v64_v1 = vld [vmem:[%s366_s3 + $0x78] sm:$0xff]  ;;  %v63_v2 = vld [vmem:[%s366_s3 + $0x70] sm:$0xff]  ;;  %171 = vset.pattern.permute.xlu0 %v206_v3 }
   0x2   :  { %69 = vmatpush.msra.mxu0 %v64_v1  ;;  %31 = vperm.xlu0 %171, %v27_v0   ;;  %v62_v4 = vld [vmem:[%s366_s3 + $0x68] sm:$0xff]  ;;  %v61_v5 = vld [vmem:[%s366_s3 + $0x60] sm:$0xff] }
   0x4   :  { %70 = vmatpush.msra.mxu0 %v63_v2 }
   0x5   :  { %12 = vsyncpa [#allocation3], 0  ;;  %v60_v6 = vld [vmem:[%s366_s3 + $0x58] sm:$0xff]  ;;  %v59_v7 = vld [vmem:[%s366_s3 + $0x50] sm:$0xff]  ;;  %v207_v8 = vmov 1   ;;  %vm149_vm3 = vcmask 130048  }
   0x6   :  { %71 = vmatpush.msra.mxu0 %v62_v4  ;;  %v58_v9 = vld [vmem:[%s366_s3 + $0x48] sm:$0xff]  ;;  %v57_v10 = vld [vmem:[%s366_s3 + $0x40] sm:$0xff]  ;;  %v56_v11 = vld [vmem:[%s366_s3 + $0x38] sm:$0xff] }
   0x7   :  { %v55_v12 = vld [vmem:[%s366_s3 + $0x30] sm:$0xff]  ;;  %v54_v13 = vld [vmem:[%s366_s3 + $0x28] sm:$0xff]  ;;  %v53_v14 = vld [vmem:[%s366_s3 + $0x20] sm:$0xff] }
   0x8   :  { %72 = vmatpush.msra.mxu0 %v61_v5  ;;  %v52_v15 = vld [vmem:[%s366_s3 + $0x18] sm:$0xff]  ;;  %v51_v16 = vld [vmem:[%s366_s3 + $0x10] sm:$0xff]  ;;  %v50_v17 = vld [vmem:[%s366_s3 + $0x8] sm:$0xff] }
   0x9   :  { %v49_v18 = vld [vmem:[%s366_s3] sm:$0xff]  ;;  %v105_v19 = vld [vmem:[%s368_s5 + $0x78] sm:$0xff]  ;;  %v104_v20 = vld [vmem:[%s368_s5 + $0x70] sm:$0xff] }
   0xa   :  { %73 = vmatpush.msra.mxu0 %v60_v6  ;;  %172 = vset.pattern.permute.xlu0 %v207_v8  ;;  %v103_v21 = vld [vmem:[%s368_s5 + $0x68] sm:$0xff]  ;;  %v102_v22 = vld [vmem:[%s368_s5 + $0x60] sm:$0xff]  ;;  %v101_v23 = vld [vmem:[%s368_s5 + $0x58] sm:$0xff] }
   0xb   :  { %37 = vperm.xlu0 %172, %v27_v0   ;;  %110 = vmatpush.msra.mxu1 %v105_v19  ;;  %v100_v24 = vld [vmem:[%s368_s5 + $0x50] sm:$0xff]  ;;  %v99_v25 = vld [vmem:[%s368_s5 + $0x48] sm:$0xff]  ;;  %v98_v26 = vld [vmem:[%s368_s5 + $0x40] sm:$0xff] }
   0xc   :  { %74 = vmatpush.msra.mxu0 %v59_v7  ;;  %v97_v28 = vld [vmem:[%s368_s5 + $0x38] sm:$0xff]  ;;  %v96_v29 = vld [vmem:[%s368_s5 + $0x30] sm:$0xff]  ;;  %v28_v30 = vld [vmem:[%s364_s1] sm:$0x3] }
   0xd   :  { %111 = vmatpush.msra.mxu1 %v104_v20  ;;  %v95_v31 = vld [vmem:[%s368_s5 + $0x28] sm:$0xff]  ;;  %v34_v32 = vperm.slane %v28_v30, 0  ;;  %v40_v33 = vperm.slane %v28_v30, 1  ;;  %v94_v34 = vld [vmem:[%s368_s5 + $0x20] sm:$0xff]  ;;  %v93_v35 = vld [vmem:[%s368_s5 + $0x18] sm:$0xff] }
   0xe   :  { %75 = vmatpush.msra.mxu0 %v58_v9  ;;  %v173_v39 = vld [vmem:[%s365_s2] ss:$0 sm:$0xff]  ;;  %v92_v43 = vld [vmem:[%s368_s5 + $0x10] sm:$0xff]  ;;  %v91_v44 = vld [vmem:[%s368_s5 + $0x8] sm:$0xff] }
   0xf   :  { %112 = vmatpush.msra.mxu1 %v103_v21  ;;  %v90_v45 = vld [vmem:[%s368_s5] sm:$0xff] }
  0x10   :  { %76 = vmatpush.msra.mxu0 %v57_v10  ;;  %v174_v46 = vld [vmem:[%s367_s4] ss:$0 sm:$0xff]  ;;  %s208_s4 = smov [#allocation2]  }
  0x11   :  { %113 = vmatpush.msra.mxu1 %v102_v22  ;;  %v175_v50 = vld [vmem:[%s369_s6] ss:$0 sm:$0xff]  ;;  %s156_s5 = sshll.u32 %s208_s4, 4  ;;  %s158_s6 = sshll.u32 %s370_s7, 4  ;;  %s157_s5 = int_to_ptr.vmem [resolvable:$true] %s156_s5  ;;  %s159_s6 = int_to_ptr.hbm [resolvable:$true] %s158_s6 }
  0x12   :  { %77 = vmatpush.msra.mxu0 %v56_v11 }
  0x13   :  { %114 = vmatpush.msra.mxu1 %v101_v23 }
  0x14   :  { %78 = vmatpush.msra.mxu0 %v55_v12 }
  0x15   :  { %115 = vmatpush.msra.mxu1 %v100_v24 }
  0x16   :  { %79 = vmatpush.msra.mxu0 %v54_v13 }
  0x17   :  { %116 = vmatpush.msra.mxu1 %v99_v25 }
  0x18   :  { %80 = vmatpush.msra.mxu0 %v53_v14 }
  0x19   :  { %117 = vmatpush.msra.mxu1 %v98_v26 }
  0x1a   :  { %81 = vmatpush.msra.mxu0 %v52_v15 }
  0x1b   :  { %118 = vmatpush.msra.mxu1 %v97_v28 }
  0x1c   :  { %82 = vmatpush.msra.mxu0 %v51_v16 }
  0x1d   :  { %119 = vmatpush.msra.mxu1 %v96_v29 }
  0x1e   :  { %83 = vmatpush.msra.mxu0 %v50_v17 }
  0x1f   :  { %120 = vmatpush.msra.mxu1 %v95_v31 }
  0x20   :  { %84 = vmatpush.msra.mxu0 %v49_v18 }
  0x21   :  { %121 = vmatpush.msra.mxu1 %v94_v34 }
  0x23   :  { %122 = vmatpush.msra.mxu1 %v93_v35 }
  0x25   :  { %123 = vmatpush.msra.mxu1 %v92_v43 }
  0x27   :  { %124 = vmatpush.msra.mxu1 %v91_v44 }
  0x29   :  { %125 = vmatpush.msra.mxu1 %v90_v45 }
  0x74   :  { %v32_v27 = vpop.permute.xlu0 %31 }
  0x75   :  { %v35_v37 = vmul.f32 %v34_v32, %v32_v27 }
  0x7d   :  { %v38_v36 = vpop.permute.xlu0 %37 }
  0x7e   :  { %v41_v38 = vmul.f32 %v40_v33, %v38_v36 }
  0x80   :  { %v42_v40 = vadd.f32 %v41_v38, %v35_v37 }
  0x82   :  { %v47_v41 = vadd.f32 %v173_v39, %v42_v40 }
  0x84   :  { %v48_v42 = vmax.f32 %v47_v41, 0.0 }
  0x86   :  { %85 = vmatmul.f32.vlgmr.msra.gmra.mxu0 %v48_v42 }
 0x103   :  { %v86_v47 = vpop.f32.mrf.mxu0 }
 0x104   :  { %v87_v48 = vadd.f32 %v174_v46, %v86_v47 }
 0x106   :  { %v89_v49 = vmax.f32 %v87_v48, 0.0 }
 0x108   :  { %126 = vmatmul.f32.vlgmr.msra.gmra.mxu1 %v89_v49 }
 0x185   :  { %v127_v51 = vpop.f32.mrf.mxu1 }
 0x186   :  { %v128_v52 = vadd.f32 %v175_v50, %v127_v51 }
 0x188   :  { %v167_v53 = vmul.f32 -1.442695, %v128_v52 }
 0x18a   :  { %176 = vpow2.f32 %v167_v53 }
 0x190   :  { %v177_v54 = vpop.eup %176 }
 0x191   :  { %v133_v55 = vadd.f32 1.0, %v177_v54 }
 0x193   :  { %178 = vrcp.f32 %v133_v55  ;;  %v145_v59 = vand.u32 2147483648, %v133_v55  ;;  %v143_v61 = vand.u32 2147483647, %v133_v55  ;;  %vm139_vm1 = vweird.f32 %v133_v55 }
 0x195   :  { %v146_v63 = vor.u32 1.1754944e-38, %v145_v59  ;;  %vm144_vm4 = vcmp.eq.f32.partialorder %v143_v61, 8.507059e+37 }
 0x199   :  { %v179_v56 = vpop.eup %178 }
 0x19a   :  { %v135_v57 = vmul.f32 %v179_v56, %v133_v55  ;;  %vm140_vm0 = vweird.f32 %v179_v56 }
 0x19b   :  { %vm141_vm2 = vmor %vm139_vm1, %vm140_vm0 }
 0x19c   :  { %v136_v58 = vsub.f32 1.0, %v135_v57 }
 0x19e   :  { %v137_v60 = vmul.f32 %v179_v56, %v136_v58 }
 0x1a0   :  { %v138_v62 = vadd.f32 %v179_v56, %v137_v60 }
 0x1a2   :  { %v142_v0 = vsel %vm141_vm2, %v179_v56, %v138_v62 }
 0x1a3   :  { %v147_v1 = vsel %vm144_vm4, %v146_v63, %v142_v0 }
 0x1a4   :  { %150 = vst.msk [vmem:[#allocation2] sm:$0xff] %vm149_vm3, %v147_v1 }
 0x1a5   :  { %161 = dma.vmem_to_hbm [thread:$0]  %s157_s5, 128, %s159_s6, [#allocation3]  }
 0x1a6   :  { %204 = dma.done.wait [#allocation3], 128  }
 0x1a7   :  { %205 = vsyncadd [#allocation3], 4294967168 }
 0x1a8   :  { %166 = vsyncpa [#allocation3], 1 }

</bundles_post_ra>
